<compile_context>
chip_gen: v6e
topology: v6e:2x2x1
jax: 0.10.0
libtpu: 0.0.40
codegen_flags: <defaults>
</compile_context>

<pallas_src>
import functools
import math

import jax
import jax.numpy as jnp
from jax.experimental import pallas as pl
from jax.experimental.pallas import tpu as pltpu


# ----------------------- helpers -----------------------

def _vmem_budget_bytes():
    """Per-generation scoped-VMEM budget: ~3/4 of physical, capped at 100 MiB.
    v5e/v6e (128 MiB) -> 96 MiB; v7x (64 MiB) -> 48 MiB."""
    try:
        cap = int(pltpu.get_tpu_info().vmem_capacity_bytes)
    except Exception:
        cap = 64 * 1024 * 1024          # conservative fallback (v7x-sized)
    return min(cap * 3 // 4, 100 * 1024 * 1024)


def _pick_t_tile(T, rows_per_t, per_t_bytes, tile_budget_bytes, target_rows=1024):
    """Choose the T tile.

    Largest tile that fits the VMEM budget, preferring >=2 grid steps (so v7x's two
    TensorCores both get work) as long as each step still feeds >= target_rows rows
    to the MXU (amortizes the ~0.35us per-grid-step overhead).  tt is a multiple of
    8 (or T itself) so block sublane dims stay aligned.
    """
    cands = [t for t in range(8, T, 8) if T % t == 0] + [T]
    fit = [t for t in cands if t * per_t_bytes <= tile_budget_bytes] or [cands[0]]
    multi = [t for t in fit if T // t >= 2 and t * rows_per_t >= 256]
    if multi:
        good = [t for t in multi if t * rows_per_t >= target_rows]
        return max(good) if good else max(multi)
    return max(fit)


# ----------------------- fused Pallas kernel -----------------------

def _visual_embed_kernel(xs_ref, xm_ref, ws_ref, wm_ref, bs_ref, bm_ref, pe_ref,
                         o_ref, *, scale, S, B):
    """Fused Linear+GELU (s & m paths), embed scale, permute/concat layout and PE add.

    Per grid step (tt = T tile, R = S*(B+1)):
      xs_ref : (tt*S*B, Cin)  input dtype   -- already the 2-D matmul LHS (t-major rows)
      xm_ref : (tt*S,   Cin)  input dtype
      ws/wm  : (Cin, D)       bf16          -- grid-invariant, resident
      bs/bm  : (1, D)         f32
      pe_ref : (R, 1, D)      f32           -- PE rows pre-gathered into final row order
      o_ref  : (R, tt, D)     out dtype
    """
    SB = S * B
    tt = xs_ref.shape[0] // SB
    D = ws_ref.shape[1]
    inv_sqrt2 = 1.0 / math.sqrt(2.0)

    def proj(x_ref, w_ref, b_ref):
        # Cast activations to bf16 right before the MXU matmul (f32 accumulation);
        # bias + exact erf-GELU + embed_scale stay in f32 (erf runs on the EUP slot).
        y = jnp.dot(x_ref[...].astype(jnp.bfloat16), w_ref[...],
                    preferred_element_type=jnp.float32)
        y = y + b_ref[...]
        y = 0.5 * y * (1.0 + jax.lax.erf(y * inv_sqrt2))
        return y * scale

    ys = proj(xs_ref, ws_ref, bs_ref)        # (tt*SB, D) f32, rows t-major
    # NOTE: the m-path LHS is only tt*S rows; it is 1/(B+1) of the FLOPs so the
    # partially-filled MXU pass is a small fraction of the step.
    ym = proj(xm_ref, wm_ref, bm_ref)        # (tt*S,  D) f32

    # One XLU transpose to (row, t) order instead of R sublane-strided gathers.
    ys_t = jnp.swapaxes(ys.reshape(tt, SB, D), 0, 1)   # (SB, tt, D)
    ym_t = jnp.swapaxes(ym.reshape(tt, S, D), 0, 1)    # (S,  tt, D)

    # Epilogue: contiguous leading-axis chunk stores straight into the final
    # permuted/concatenated (R, T, D) layout, fused with the sin/cos PE add
    # (PE varies over the row axis, broadcasts over T).  S = 2**level - 1 is small.
    for s in range(S):
        r0 = s * (B + 1)
        o_ref[pl.ds(r0, B), :, :] = (
            ys_t[s * B:(s + 1) * B] + pe_ref[pl.ds(r0, B), :, :]).astype(o_ref.dtype)
        o_ref[r0 + B, :, :] = (ym_t[s] + pe_ref[r0 + B]).astype(o_ref.dtype)


# ----------------------- Forward pass -----------------------

def visualembedding_forward(visual_s, visual_m, params, *, level, embed_dim,
                            out_dtype=jnp.float32):
    """Fused Pallas forward.  Returns the list of per-level tensors (as in PyTorch).

    `out_dtype` defaults to f32 (matches the PyTorch module); pass jnp.bfloat16 to
    halve output HBM writes when the downstream transformer consumes bf16.
    """
    scale = math.sqrt(embed_dim)             # pos_flag == 'sincos'

    T, S, B, Cin = visual_s.shape
    assert visual_m.shape == (T, S, Cin)
    assert S == 2 ** level - 1
    D = embed_dim
    SB = S * B
    R = S * (B + 1)                          # rows of the concatenated output

    # Free-view reshapes: these 2-D arrays ARE the matmul LHS blocks (no wrapper
    # transpose and no wrapper dtype-cast pass over the activations).
    xs = visual_s.reshape(T * SB, Cin)
    xm = visual_m.reshape(T * S, Cin)

    # Weights are tiny: cast to bf16 once; biases stay f32.
    ws = params["ws"].astype(jnp.bfloat16)   # (Cin, D)
    wm = params["wm"].astype(jnp.bfloat16)
    bs = params["bs"].reshape(1, D).astype(jnp.float32)
    bm = params["bm"].reshape(1, D).astype(jnp.float32)

    # Pre-gather the sin/cos PE rows into the final row order (row r = s*(B+1)+b; the
    # PE index restarts at 0 inside each level band, exactly like the reference's
    # pe[:x.size(0)] add) so the PE add fuses into the projection epilogue.
    pe = params["pe"][:, 0, :]               # (max_len, D)
    pe_rows = jnp.concatenate(
        [jnp.arange((2 ** i) * (B + 1), dtype=jnp.int32) for i in range(level)])
    assert pe_rows.shape[0] == R
    pe_tab = jnp.take(pe, pe_rows, axis=0)[:, None, :].astype(jnp.float32)   # (R, 1, D)

    # ---- tiling / VMEM budgeting (per TPU generation) ----
    in_item = jnp.dtype(visual_s.dtype).itemsize
    out_item = jnp.dtype(out_dtype).itemsize
    vmem_budget = _vmem_budget_bytes()
    # resident operands (weights/biases/PE); default pipeline double-buffers them.
    # (On v7x, pipeline_mode=pl.Buffered(1) on these specs would free a few MB more.)
    fixed_bytes = 2 * (2 * Cin * D * 2 + 2 * D * 4 + R * D * 4)
    per_t_bytes = (2 * (SB + S) * Cin * in_item      # double-buffered activation blocks
                   + 2 * R * D * out_item            # double-buffered output block
                   + 3 * R * D * 4)                  # f32 matmul results + transposed copies
    tile_budget = max(vmem_budget // 2 - fixed_bytes, 8 * per_t_bytes)
    tt = _pick_t_tile(T, SB, per_t_bytes, tile_budget)
    grid = (T // tt,)

    # Advisory cost estimate so XLA schedules surrounding producers/consumers well.
    cost = pl.CostEstimate(
        flops=2 * T * S * (B + 1) * Cin * D,
        transcendentals=T * S * (B + 1) * D,
        bytes_accessed=(xs.size * in_item + xm.size * in_item
                        + ws.size * 2 + wm.size * 2
                        + (bs.size + bm.size) * 4 + pe_tab.size * 4
                        + R * T * D * out_item),
    )

    kernel = functools.partial(_visual_embed_kernel, scale=scale, S=S, B=B)
    y = pl.pallas_call(
        kernel,
        out_shape=jax.ShapeDtypeStruct((R, T, D), out_dtype),
        grid_spec=pltpu.PrefetchScalarGridSpec(
            num_scalar_prefetch=0,
            grid=grid,
            in_specs=[
                pl.BlockSpec((tt * SB, Cin), lambda ti: (ti, 0)),   # visual_s (2-D LHS)
                pl.BlockSpec((tt * S, Cin), lambda ti: (ti, 0)),    # visual_m (2-D LHS)
                pl.BlockSpec((Cin, D), lambda ti: (0, 0)),          # ws (resident)
                pl.BlockSpec((Cin, D), lambda ti: (0, 0)),          # wm (resident)
                pl.BlockSpec((1, D), lambda ti: (0, 0)),            # bs
                pl.BlockSpec((1, D), lambda ti: (0, 0)),            # bm
                pl.BlockSpec((R, 1, D), lambda ti: (0, 0, 0)),      # PE rows
            ],
            out_specs=pl.BlockSpec((R, tt, D), lambda ti: (0, ti, 0)),
        ),
        compiler_params=pltpu.CompilerParams(
            # each grid step writes a distinct output slab -> fully parallel axis
            dimension_semantics=("parallel",),
            vmem_limit_bytes=vmem_budget,
        ),
        cost_estimate=cost,
    )(xs, xm, ws, wm, bs, bm, pe_tab)

    # The reference's visual_list entries are contiguous row-slices of y (no un-pad pass).
    visual_list = []
    off = 0
    for i in range(level):
        n = (2 ** i) * (B + 1)
        visual_list.append(y[off:off + n])
        off += n
    return visual_list


# ----------------------- Parameter setup (deterministic) -----------------------

def make_params(key, v_inDim, embed_dim, max_len=64):
    k1, k2, k3, k4 = jax.random.split(key, 4)
    params = {
        "ws": jax.random.normal(k1, (v_inDim, embed_dim), jnp.float32) * 0.02,
        "bs": jax.random.normal(k2, (embed_dim,), jnp.float32) * 0.02,
        "wm": jax.random.normal(k3, (v_inDim, embed_dim), jnp.float32) * 0.02,
        "bm": jax.random.normal(k4, (embed_dim,), jnp.float32) * 0.02,
    }
    # standard sin/cos PositionalEncoding table, shape (max_len, 1, D)
    position = jnp.arange(max_len, dtype=jnp.float32)[:, None]
    div_term = jnp.exp(
        jnp.arange(0, embed_dim, 2, dtype=jnp.float32) * (-math.log(10000.0) / embed_dim))
    pe = jnp.zeros((max_len, embed_dim), jnp.float32)
    pe = pe.at[:, 0::2].set(jnp.sin(position * div_term))
    pe = pe.at[:, 1::2].set(jnp.cos(position * div_term))
    params["pe"] = pe[:, None, :]
    return params


# ----------------------- Main -----------------------

if __name__ == "__main__":
    level = 2
    embed_dim = 32
    v_inDim = 64
    T, B = 8, 2
    S = 2 ** level - 1                       # hierarchy dim holds 2^level - 1 segments

    key = jax.random.PRNGKey(0)
    k_s, k_m, k_p = jax.random.split(key, 3)

    visual_s = jax.random.normal(k_s, (T, S, B, v_inDim), jnp.float32)
    visual_m = jax.random.normal(k_m, (T, S, v_inDim), jnp.float32)
    params = make_params(k_p, v_inDim, embed_dim)

    fwd = jax.jit(functools.partial(
        visualembedding_forward, level=level, embed_dim=embed_dim))
    outs = jax.block_until_ready(fwd(visual_s, visual_m, params))

    # shape sanity
    assert outs[0].shape == (B + 1, T, embed_dim)
    assert outs[1].shape == (2 * (B + 1), T, embed_dim)

    # numerical sanity vs a pure-JAX (f32) reference of the PyTorch module
    def _reference(vs, vm, p):
        ve_s = jax.nn.gelu(vs @ p["ws"] + p["bs"], approximate=False)      # (T,S,B,D)
        ve_m = jax.nn.gelu(vm @ p["wm"] + p["bm"], approximate=False)      # (T,S,D)
        ve_s = jnp.transpose(ve_s, (1, 2, 0, 3))                           # (S,B,T,D)
        ve_m = jnp.transpose(ve_m, (1, 0, 2))                              # (S,T,D)
        ve = jnp.concatenate([ve_s, ve_m[:, None]], axis=1)                # (S,B+1,T,D)
        pe = p["pe"]
        sc = math.sqrt(embed_dim)
        refs = [sc * ve[0] + pe[: ve[0].shape[0]]]
        for i in range(1, level):
            lo, hi = 2 ** i - 1, 2 ** (i + 1) - 1
            x = ve[lo:hi].reshape(-1, ve.shape[2], ve.shape[-1])
            refs.append(sc * x + pe[: x.shape[0]])
        return refs

    refs = _reference(visual_s, visual_m, params)
    for o, r in zip(outs, refs):
        assert o.shape == r.shape
        # bf16 MXU operands with f32 accumulation: ~1e-2-level relative error budget
        assert bool(jnp.allclose(o, r, rtol=2e-2, atol=2e-2))

    print("KERNEL_OK")
</pallas_src>

<mosaic_0001>
module attributes {stable_mosaic.version = 11 : i64} {
  func.func @_visual_embed_kernel(%arg0: i32, %arg1: memref<48x64xf32, #tpu.memory_space<vmem>>, %arg2: memref<24x64xf32, #tpu.memory_space<vmem>>, %arg3: memref<64x32xbf16, #tpu.memory_space<vmem>>, %arg4: memref<64x32xbf16, #tpu.memory_space<vmem>>, %arg5: memref<1x32xf32, #tpu.memory_space<vmem>>, %arg6: memref<1x32xf32, #tpu.memory_space<vmem>>, %arg7: memref<9x1x32xf32, #tpu.memory_space<vmem>>, %arg8: memref<9x8x32xf32, #tpu.memory_space<vmem>>) attributes {dimension_semantics = [#tpu.dimension_semantics<parallel>], iteration_bounds = array<i64: 1>, scalar_prefetch = 0 : i64, scratch_operands = 0 : i64, tpu.core_type = #tpu.core_type<tc>, window_params = [{transform_indices = @transform_0, window_bounds = array<i64: 48, 64>}, {transform_indices = @transform_1, window_bounds = array<i64: 24, 64>}, {pipeline_mode = #tpu.pipeline_mode<synchronous>, transform_indices = @transform_2, window_bounds = array<i64: 64, 32>}, {pipeline_mode = #tpu.pipeline_mode<synchronous>, transform_indices = @transform_3, window_bounds = array<i64: 64, 32>}, {pipeline_mode = #tpu.pipeline_mode<synchronous>, transform_indices = @transform_4, window_bounds = array<i64: 1, 32>}, {pipeline_mode = #tpu.pipeline_mode<synchronous>, transform_indices = @transform_5, window_bounds = array<i64: 1, 32>}, {pipeline_mode = #tpu.pipeline_mode<synchronous>, transform_indices = @transform_6, window_bounds = array<i64: 9, 1, 32>}, {transform_indices = @transform_7, window_bounds = array<i64: 9, 8, 32>}]} {
    %c0 = arith.constant 0 : index
    %c0_0 = arith.constant 0 : index
    %0 = vector.load %arg1[%c0, %c0_0] : memref<48x64xf32, #tpu.memory_space<vmem>>, vector<48x64xf32>
    %1 = arith.truncf %0 : vector<48x64xf32> to vector<48x64xbf16>
    %c0_1 = arith.constant 0 : index
    %c0_2 = arith.constant 0 : index
    %2 = vector.load %arg3[%c0_1, %c0_2] : memref<64x32xbf16, #tpu.memory_space<vmem>>, vector<64x32xbf16>
    %cst = arith.constant dense<0.000000e+00> : vector<48x32xf32>
    %3 = tpu.matmul %1, %2, %cst {dimension_numbers = #tpu.dot_dimension_numbers<[1], [0], [0], [1], [0, 0, 1, 1], [], []>} : vector<48x64xbf16>, vector<64x32xbf16>, vector<48x32xf32> -> vector<48x32xf32>
    %c0_3 = arith.constant 0 : index
    %c0_4 = arith.constant 0 : index
    %4 = vector.load %arg5[%c0_3, %c0_4] : memref<1x32xf32, #tpu.memory_space<vmem>>, vector<1x32xf32>
    %5 = vector.broadcast %4 : vector<1x32xf32> to vector<48x32xf32>
    %6 = arith.addf %3, %5 : vector<48x32xf32>
    %cst_5 = arith.constant 5.000000e-01 : f32
    %7 = vector.broadcast %cst_5 : f32 to vector<48x32xf32>
    %8 = arith.mulf %7, %6 : vector<48x32xf32>
    %cst_6 = arith.constant 0.707106769 : f32
    %9 = vector.broadcast %cst_6 : f32 to vector<48x32xf32>
    %10 = arith.mulf %6, %9 : vector<48x32xf32>
    %11 = math.erf %10 : vector<48x32xf32>
    %cst_7 = arith.constant 1.000000e+00 : f32
    %12 = vector.broadcast %cst_7 : f32 to vector<48x32xf32>
    %13 = arith.addf %12, %11 : vector<48x32xf32>
    %14 = arith.mulf %8, %13 : vector<48x32xf32>
    %cst_8 = arith.constant 5.65685415 : f32
    %15 = vector.broadcast %cst_8 : f32 to vector<48x32xf32>
    %16 = arith.mulf %14, %15 : vector<48x32xf32>
    %c0_9 = arith.constant 0 : index
    %c0_10 = arith.constant 0 : index
    %17 = vector.load %arg2[%c0_9, %c0_10] : memref<24x64xf32, #tpu.memory_space<vmem>>, vector<24x64xf32>
    %18 = arith.truncf %17 : vector<24x64xf32> to vector<24x64xbf16>
    %c0_11 = arith.constant 0 : index
    %c0_12 = arith.constant 0 : index
    %19 = vector.load %arg4[%c0_11, %c0_12] : memref<64x32xbf16, #tpu.memory_space<vmem>>, vector<64x32xbf16>
    %cst_13 = arith.constant dense<0.000000e+00> : vector<24x32xf32>
    %20 = tpu.matmul %18, %19, %cst_13 {dimension_numbers = #tpu.dot_dimension_numbers<[1], [0], [0], [1], [0, 0, 1, 1], [], []>} : vector<24x64xbf16>, vector<64x32xbf16>, vector<24x32xf32> -> vector<24x32xf32>
    %c0_14 = arith.constant 0 : index
    %c0_15 = arith.constant 0 : index
    %21 = vector.load %arg6[%c0_14, %c0_15] : memref<1x32xf32, #tpu.memory_space<vmem>>, vector<1x32xf32>
    %22 = vector.broadcast %21 : vector<1x32xf32> to vector<24x32xf32>
    %23 = arith.addf %20, %22 : vector<24x32xf32>
    %cst_16 = arith.constant 5.000000e-01 : f32
    %24 = vector.broadcast %cst_16 : f32 to vector<24x32xf32>
    %25 = arith.mulf %24, %23 : vector<24x32xf32>
    %cst_17 = arith.constant 0.707106769 : f32
    %26 = vector.broadcast %cst_17 : f32 to vector<24x32xf32>
    %27 = arith.mulf %23, %26 : vector<24x32xf32>
    %28 = math.erf %27 : vector<24x32xf32>
    %cst_18 = arith.constant 1.000000e+00 : f32
    %29 = vector.broadcast %cst_18 : f32 to vector<24x32xf32>
    %30 = arith.addf %29, %28 : vector<24x32xf32>
    %31 = arith.mulf %25, %30 : vector<24x32xf32>
    %cst_19 = arith.constant 5.65685415 : f32
    %32 = vector.broadcast %cst_19 : f32 to vector<24x32xf32>
    %33 = arith.mulf %31, %32 : vector<24x32xf32>
    %34 = vector.shape_cast %16 : vector<48x32xf32> to vector<8x6x32xf32>
    %35 = tpu.transpose %34, [1, 0, 2] : vector<8x6x32xf32> -> vector<6x8x32xf32>
    %36 = vector.shape_cast %33 : vector<24x32xf32> to vector<8x3x32xf32>
    %37 = tpu.transpose %36, [1, 0, 2] : vector<8x3x32xf32> -> vector<3x8x32xf32>
    %38 = vector.extract_strided_slice %35 {offsets = [0, 0, 0], sizes = [2, 8, 32], strides = [1, 1, 1]} : vector<6x8x32xf32> to vector<2x8x32xf32>
    %c0_20 = arith.constant 0 : index
    %c0_21 = arith.constant 0 : index
    %c0_22 = arith.constant 0 : index
    %39 = vector.load %arg7[%c0_20, %c0_21, %c0_22] : memref<9x1x32xf32, #tpu.memory_space<vmem>>, vector<2x1x32xf32>
    %40 = vector.broadcast %39 : vector<2x1x32xf32> to vector<2x8x32xf32>
    %41 = arith.addf %38, %40 : vector<2x8x32xf32>
    %c0_23 = arith.constant 0 : index
    %c0_24 = arith.constant 0 : index
    %c0_25 = arith.constant 0 : index
    %42 = vector.load %arg8[%c0_23, %c0_24, %c0_25] : memref<9x8x32xf32, #tpu.memory_space<vmem>>, vector<2x8x32xf32>
    tpu.vector_store %arg8[%c0_23, %c0_24, %c0_25], %41 {strides = array<i32>} : memref<9x8x32xf32, #tpu.memory_space<vmem>>, vector<2x8x32xf32>,
    %43 = vector.extract_strided_slice %37 {offsets = [0, 0, 0], sizes = [1, 8, 32], strides = [1, 1, 1]} : vector<3x8x32xf32> to vector<1x8x32xf32>
    %44 = vector.shape_cast %43 : vector<1x8x32xf32> to vector<8x32xf32>
    %c2 = arith.constant 2 : index
    %c0_26 = arith.constant 0 : index
    %c0_27 = arith.constant 0 : index
    %45 = vector.load %arg7[%c2, %c0_26, %c0_27] : memref<9x1x32xf32, #tpu.memory_space<vmem>>, vector<1x1x32xf32>
    %46 = vector.shape_cast %45 : vector<1x1x32xf32> to vector<1x32xf32>
    %47 = vector.broadcast %46 : vector<1x32xf32> to vector<8x32xf32>
    %48 = arith.addf %44, %47 : vector<8x32xf32>
    %c2_28 = arith.constant 2 : index
    %c0_29 = arith.constant 0 : index
    %c0_30 = arith.constant 0 : index
    %49 = vector.load %arg8[%c2_28, %c0_29, %c0_30] : memref<9x8x32xf32, #tpu.memory_space<vmem>>, vector<1x8x32xf32>
    %50 = vector.shape_cast %49 : vector<1x8x32xf32> to vector<8x32xf32>
    %51 = vector.shape_cast %48 : vector<8x32xf32> to vector<1x8x32xf32>
    tpu.vector_store %arg8[%c2_28, %c0_29, %c0_30], %51 {strides = array<i32>} : memref<9x8x32xf32, #tpu.memory_space<vmem>>, vector<1x8x32xf32>,
    %52 = vector.extract_strided_slice %35 {offsets = [2, 0, 0], sizes = [2, 8, 32], strides = [1, 1, 1]} : vector<6x8x32xf32> to vector<2x8x32xf32>
    %c3 = arith.constant 3 : index
    %c0_31 = arith.constant 0 : index
    %c0_32 = arith.constant 0 : index
    %53 = vector.load %arg7[%c3, %c0_31, %c0_32] : memref<9x1x32xf32, #tpu.memory_space<vmem>>, vector<2x1x32xf32>
    %54 = vector.broadcast %53 : vector<2x1x32xf32> to vector<2x8x32xf32>
    %55 = arith.addf %52, %54 : vector<2x8x32xf32>
    %c3_33 = arith.constant 3 : index
    %c0_34 = arith.constant 0 : index
    %c0_35 = arith.constant 0 : index
    %56 = vector.load %arg8[%c3_33, %c0_34, %c0_35] : memref<9x8x32xf32, #tpu.memory_space<vmem>>, vector<2x8x32xf32>
    tpu.vector_store %arg8[%c3_33, %c0_34, %c0_35], %55 {strides = array<i32>} : memref<9x8x32xf32, #tpu.memory_space<vmem>>, vector<2x8x32xf32>,
    %57 = vector.extract_strided_slice %37 {offsets = [1, 0, 0], sizes = [1, 8, 32], strides = [1, 1, 1]} : vector<3x8x32xf32> to vector<1x8x32xf32>
    %58 = vector.shape_cast %57 : vector<1x8x32xf32> to vector<8x32xf32>
    %c5 = arith.constant 5 : index
    %c0_36 = arith.constant 0 : index
    %c0_37 = arith.constant 0 : index
    %59 = vector.load %arg7[%c5, %c0_36, %c0_37] : memref<9x1x32xf32, #tpu.memory_space<vmem>>, vector<1x1x32xf32>
    %60 = vector.shape_cast %59 : vector<1x1x32xf32> to vector<1x32xf32>
    %61 = vector.broadcast %60 : vector<1x32xf32> to vector<8x32xf32>
    %62 = arith.addf %58, %61 : vector<8x32xf32>
    %c5_38 = arith.constant 5 : index
    %c0_39 = arith.constant 0 : index
    %c0_40 = arith.constant 0 : index
    %63 = vector.load %arg8[%c5_38, %c0_39, %c0_40] : memref<9x8x32xf32, #tpu.memory_space<vmem>>, vector<1x8x32xf32>
    %64 = vector.shape_cast %63 : vector<1x8x32xf32> to vector<8x32xf32>
    %65 = vector.shape_cast %62 : vector<8x32xf32> to vector<1x8x32xf32>
    tpu.vector_store %arg8[%c5_38, %c0_39, %c0_40], %65 {strides = array<i32>} : memref<9x8x32xf32, #tpu.memory_space<vmem>>, vector<1x8x32xf32>,
    %66 = vector.extract_strided_slice %35 {offsets = [4, 0, 0], sizes = [2, 8, 32], strides = [1, 1, 1]} : vector<6x8x32xf32> to vector<2x8x32xf32>
    %c6 = arith.constant 6 : index
    %c0_41 = arith.constant 0 : index
    %c0_42 = arith.constant 0 : index
    %67 = vector.load %arg7[%c6, %c0_41, %c0_42] : memref<9x1x32xf32, #tpu.memory_space<vmem>>, vector<2x1x32xf32>
    %68 = vector.broadcast %67 : vector<2x1x32xf32> to vector<2x8x32xf32>
    %69 = arith.addf %66, %68 : vector<2x8x32xf32>
    %c6_43 = arith.constant 6 : index
    %c0_44 = arith.constant 0 : index
    %c0_45 = arith.constant 0 : index
    %70 = vector.load %arg8[%c6_43, %c0_44, %c0_45] : memref<9x8x32xf32, #tpu.memory_space<vmem>>, vector<2x8x32xf32>
    tpu.vector_store %arg8[%c6_43, %c0_44, %c0_45], %69 {strides = array<i32>} : memref<9x8x32xf32, #tpu.memory_space<vmem>>, vector<2x8x32xf32>,
    %71 = vector.extract_strided_slice %37 {offsets = [2, 0, 0], sizes = [1, 8, 32], strides = [1, 1, 1]} : vector<3x8x32xf32> to vector<1x8x32xf32>
    %72 = vector.shape_cast %71 : vector<1x8x32xf32> to vector<8x32xf32>
    %c8 = arith.constant 8 : index
    %c0_46 = arith.constant 0 : index
    %c0_47 = arith.constant 0 : index
    %73 = vector.load %arg7[%c8, %c0_46, %c0_47] : memref<9x1x32xf32, #tpu.memory_space<vmem>>, vector<1x1x32xf32>
    %74 = vector.shape_cast %73 : vector<1x1x32xf32> to vector<1x32xf32>
    %75 = vector.broadcast %74 : vector<1x32xf32> to vector<8x32xf32>
    %76 = arith.addf %72, %75 : vector<8x32xf32>
    %c8_48 = arith.constant 8 : index
    %c0_49 = arith.constant 0 : index
    %c0_50 = arith.constant 0 : index
    %77 = vector.load %arg8[%c8_48, %c0_49, %c0_50] : memref<9x8x32xf32, #tpu.memory_space<vmem>>, vector<1x8x32xf32>
    %78 = vector.shape_cast %77 : vector<1x8x32xf32> to vector<8x32xf32>
    %79 = vector.shape_cast %76 : vector<8x32xf32> to vector<1x8x32xf32>
    tpu.vector_store %arg8[%c8_48, %c0_49, %c0_50], %79 {strides = array<i32>} : memref<9x8x32xf32, #tpu.memory_space<vmem>>, vector<1x8x32xf32>,
    return
  }
  func.func @transform_0(%arg0: i32) -> (i32, i32) {
    %c0_i32 = arith.constant 0 : i32
    %c0_i32_0 = arith.constant 0 : i32
    return %arg0, %c0_i32 : i32, i32
  }
  func.func @transform_1(%arg0: i32) -> (i32, i32) {
    %c0_i32 = arith.constant 0 : i32
    %c0_i32_0 = arith.constant 0 : i32
    return %arg0, %c0_i32 : i32, i32
  }
  func.func @transform_2(%arg0: i32) -> (i32, i32) {
    %c0_i32 = arith.constant 0 : i32
    %c0_i32_0 = arith.constant 0 : i32
    %c0_i32_1 = arith.constant 0 : i32
    return %c0_i32, %c0_i32_0 : i32, i32
  }
  func.func @transform_3(%arg0: i32) -> (i32, i32) {
    %c0_i32 = arith.constant 0 : i32
    %c0_i32_0 = arith.constant 0 : i32
    %c0_i32_1 = arith.constant 0 : i32
    return %c0_i32, %c0_i32_0 : i32, i32
  }
  func.func @transform_4(%arg0: i32) -> (i32, i32) {
    %c0_i32 = arith.constant 0 : i32
    %c0_i32_0 = arith.constant 0 : i32
    %c0_i32_1 = arith.constant 0 : i32
    return %c0_i32, %c0_i32_0 : i32, i32
  }
  func.func @transform_5(%arg0: i32) -> (i32, i32) {
    %c0_i32 = arith.constant 0 : i32
    %c0_i32_0 = arith.constant 0 : i32
    %c0_i32_1 = arith.constant 0 : i32
    return %c0_i32, %c0_i32_0 : i32, i32
  }
  func.func @transform_6(%arg0: i32) -> (i32, i32, i32) {
    %c0_i32 = arith.constant 0 : i32
    %c0_i32_0 = arith.constant 0 : i32
    %c0_i32_1 = arith.constant 0 : i32
    %c0_i32_2 = arith.constant 0 : i32
    return %c0_i32, %c0_i32_0, %c0_i32_1 : i32, i32, i32
  }
  func.func @transform_7(%arg0: i32) -> (i32, i32, i32) {
    %c0_i32 = arith.constant 0 : i32
    %c0_i32_0 = arith.constant 0 : i32
    %c0_i32_1 = arith.constant 0 : i32
    return %c0_i32, %arg0, %c0_i32_0 : i32, i32, i32
  }
}

</mosaic_0001>

<bundles_post_ra>
// kernel: visualembedding_forward.1
= control target key start
LH: loop header
LB: loop body
LE: loop exit
PB: predicated region body
PF: predicated region fallthrough
CT: control target
= control target key end

     0   :  { %v2164_v0 = vmov 0.0   ;;  %vm1552_vm0 = vmmov 0   ;;  %vm75_vm1 = vcmask 523264   ;;  %v304_v23 = vlaneseq  ;;  %s2156_s2 = inlined_call_operand.vmem [shape: bf16[64,32], index: 2, kind: input, shape index: {}]   ;;  %s2157_s3 = inlined_call_operand.vmem [shape: bf16[64,32], index: 3, kind: input, shape index: {}]   ;;  %s2158_s1 = inlined_call_operand.vmem [shape: f32[24,64], index: 1, kind: input, shape index: {}]   ;;  %s2159_s0 = inlined_call_operand.vmem [shape: f32[48,64], index: 0, kind: input, shape index: {}]   ;;  %s2160_s6 = inlined_call_operand.vmem [shape: f32[9,1,32], index: 6, kind: input, shape index: {}]   ;;  %s2161_s4 = inlined_call_operand.vmem [shape: f32[1,32], index: 4, kind: input, shape index: {}]   ;;  %s2162_s5 = inlined_call_operand.vmem [shape: f32[1,32], index: 5, kind: input, shape index: {}]   ;;  %s2163_s7 = inlined_call_operand.vmem [shape: f32[9,8,32], index: 7, kind: output, shape index: {}]  }
   0x1   :  { %1488 = vmatprep.subr.bf16.mxu0 %v2164_v0  ;;  %v1525_v1 = vld [vmem:[%s2156_s2 + $0x18] sm:$0xff]   ;;  %1496 = vmatprep.mubr.msk.bf16.mxu0 %vm1552_vm0, %v2164_v0  ;;  %v1527_v3 = vld [vmem:[%s2156_s2 + $0x10] sm:$0xff]   ;;  %v1530_v5 = vld [vmem:[%s2157_s3 + $0x8] sm:$0xff]   ;;  %v1553_v24 = vmov 1966171168   ;;  %vm814_vm2 = vcmask 261120  }
   0x2   :  { %v1526_v2 = vld [vmem:[%s2157_s3 + $0x18] sm:$0xff]   ;;  %1489 = vmatpush3.bf16.msra.mxu0 %v1525_v1  ;;  %v1528_v4 = vld [vmem:[%s2157_s3 + $0x10] sm:$0xff]   ;;  %v1529_v6 = vld [vmem:[%s2156_s2 + $0x8] sm:$0xff]   ;;  %v539_v25 = vunpack.c.l.s4 %v1553_v24  ;;  %v305_v27 = vshrl.u32 %v304_v23, 7  ;;  %v1554_v40 = vmov 1983009808  }
   0x3   :  { %1508 = vmatprep.subr.bf16.mxu1 %v1526_v2  ;;  %1490 = vmatprep.subr.bf16.mxu0 %v2164_v0  ;;  %v178_v7 = vld [vmem:[%s2158_s1] sm:$0xff]  ;;  %v179_v9 = vld [vmem:[%s2158_s1 + $0x8] sm:$0xff]  ;;  %v180_v14 = vld [vmem:[%s2158_s1 + $0x10] sm:$0xff]  ;;  %v302_v41 = vunpack.c.l.s4 %v1554_v40  ;;  %v1555_v42 = vmov 1934713408  }
   0x4   :  { %1509 = vmatpush3.bf16.msra.mxu1 %v1526_v2  ;;  %v1532_v8 = vld [vmem:[%s2157_s3] sm:$0xff]   ;;  %v28_v12 = vld [vmem:[%s2159_s0 + $0x8] sm:$0xff]  ;;  %v181_v13 = vpack.c.bf16 %v179_v9, %v178_v7  ;;  %v182_v16 = vpack.c.bf16 %v180_v14, %v180_v14  ;;  %v29_v17 = vld [vmem:[%s2159_s0 + $0x10] sm:$0xff]  ;;  %v540_v28 = vunpack.c.0.s8 %v539_v25  ;;  %v428_v43 = vunpack.c.l.s4 %v1555_v42 }
   0x5   :  { %1510 = vmatprep.subr.bf16.mxu1 %v1528_v4  ;;  %v1531_v10 = vld [vmem:[%s2156_s2] sm:$0xff]   ;;  %v30_v18 = vld [vmem:[%s2159_s0 + $0x18] sm:$0xff]  ;;  %v32_v21 = vld [vmem:[%s2159_s0 + $0x28] sm:$0xff]  ;;  %v303_v53 = vunpack.c.0.s8 %v302_v41 }
   0x6   :  { %1491 = vmatpush3.bf16.msra.mxu0 %v1527_v3  ;;  %v27_v11 = vld [vmem:[%s2159_s0] sm:$0xff]  ;;  %1516 = vmatprep.mubr.msk.bf16.mxu1 %vm75_vm1, %v181_v13  ;;  %v34_v19 = vpack.c.bf16 %v30_v18, %v29_v17  ;;  %v1473_v31 = vld [vmem:[%s2160_s6 + $0x8] ss:$0 sm:$0xff]  ;;  %v1676_v33 = vsub.s32 %v540_v28, %v305_v27  ;;  %v429_v56 = vunpack.c.0.s8 %v428_v43 }
   0x7   :  { %1492 = vmatprep.subr.bf16.mxu0 %v2164_v0  ;;  %v33_v15 = vpack.c.bf16 %v28_v12, %v27_v11  ;;  %v31_v20 = vld [vmem:[%s2159_s0 + $0x20] sm:$0xff]  ;;  %v1308_v35 = vcombine.high %v1473_v31, %v1473_v31 }
   0x8   :  { %1511 = vmatpush3.bf16.msra.mxu1 %v1528_v4  ;;  %v35_v22 = vpack.c.bf16 %v32_v21, %v31_v20  ;;  %v1455_v26 = vld [vmem:[%s2160_s6 + $0x2] ss:$0 sm:$0xff]  ;;  %v1464_v29 = vld [vmem:[%s2160_s6 + $0x5] ss:$0 sm:$0xff]  ;;  %v1674_v32 = vld [vmem:[%s2161_s4] ss:$0 sm:$0xff]  ;;  %v1727_v14 = vsub.s32 %v429_v56, %v305_v27 }
   0x9   :  { %1512 = vmatprep.subr.bf16.mxu1 %v1530_v5  ;;  %v824_v30 = vcombine.high %v1455_v26, %v1455_v26  ;;  %v1066_v34 = vcombine.high %v1464_v29, %v1464_v29  ;;  %v1681_v37 = vld [vmem:[%s2162_s5] ss:$0 sm:$0xff]  ;;  %v1322_v49 = vrot.slane %v1308_v35, %v1676_v33  ;;  %v1073_v1 = vrot.slane %v1464_v29, %v1676_v33  ;;  %v1760_v28 = vld [vmem:[%s2160_s6 + $0x3] ss:$0 sm:$0xff]  ;;  %v1460_v35 = vld [vmem:[%s2160_s6 + $0x4] ss:$0 sm:$0xff] }
   0xa   :  { %1493 = vmatpush3.bf16.msra.mxu0 %v1529_v6  ;;  %v831_v4 = vrot.slane %v1455_v26, %v1676_v33  ;;  %v1716_v7 = vld [vmem:[%s2160_s6] ss:$0 sm:$0xff] }
   0xb   :  { %1494 = vmatprep.subr.bf16.mxu0 %v2164_v0  ;;  %v838_v38 = vrot.slane %v824_v30, %v1676_v33  ;;  %v1080_v45 = vrot.slane %v1066_v34, %v1676_v33  ;;  %v1324_v62 = vcombine.high %v1322_v49, %v1322_v49  ;;  %v1709_v3 = vrot.slane %v1322_v49, %v1676_v33 }
   0xc   :  { %1513 = vmatpush3.bf16.msra.mxu1 %v1530_v5  ;;  %v1315_v5 = vrot.slane %v1473_v31, %v1676_v33  ;;  %v839_v12 = vcombine.high %v831_v4, %v831_v4  ;;  %v1081_v18 = vcombine.high %v1073_v1, %v1073_v1  ;;  %v1752_v26 = vrot.slane %v831_v4, %v1676_v33 }
   0xd   :  { %1514 = vmatprep.subr.bf16.mxu1 %v1532_v8  ;;  %v840_v50 = vcombine.high %v838_v38, %v838_v38  ;;  %v1698_v57 = vrot.slane %v838_v38, %v1676_v33  ;;  %v1082_v58 = vcombine.high %v1080_v45, %v1080_v45  ;;  %v1737_v17 = vrot.slane %v1324_v62, %v1676_v33  ;;  %v1469_v38 = vld [vmem:[%s2160_s6 + $0x7] ss:$0 sm:$0xff] }
   0xe   :  { %1495 = vmatpush3.bf16.msra.mxu0 %v1531_v10  ;;  %v1722_v10 = vsub.s32 %v303_v53, %v305_v27  ;;  %v1755_v27 = vrot.slane %v1315_v5, %v1676_v33  ;;  %v1769_v31 = vrot.slane %v839_v12, %v1676_v33  ;;  %v1772_v34 = vrot.slane %v1073_v1, %v1676_v33 }
   0xf   :  { %v1706_v2 = vrot.slane %v840_v50, %v1676_v33  ;;  %v1725_v11 = vrot.slane %v1082_v58, %v1676_v33  ;;  %v1356_v41 = vcombine.high %v1737_v17, %v1737_v17  ;;  %v1788_v43 = vrot.slane %v1081_v18, %v1676_v33 }
  0x10   :  { %1515 = vmatpush3.bf16.msra.mxu1 %v1532_v8  ;;  %v1719_v8 = vrot.slane %v1080_v45, %v1676_v33  ;;  %v962_v18 = vcombine.high %v1760_v28, %v1760_v28  ;;  %v1221_v12 = vcombine.high %v1469_v38, %v1469_v38 }
  0x11   :  { %1497 = vmatmul.mubr.msk.bf16.vlgmr.msra.gmra.mxu0 %vm75_vm1, %v33_v15  ;;  %v1732_v15 = vld [vmem:[%s2160_s6 + $0x1] ss:$0 sm:$0xff]  ;;  %v872_v20 = vcombine.high %v1706_v2, %v1706_v2  ;;  %v1114_v30 = vcombine.high %v1725_v11, %v1725_v11 }
  0x12   :  { %1500 = vmatprep.mubr.msk.bf16.mxu0 %vm1552_vm0, %v2164_v0  ;;  %v1112_v25 = vcombine.high %v1719_v8, %v1719_v8  ;;  %v1764_v29 = vrot.slane %v1732_v15, %v1722_v10 }
  0x13   :  { %1517 = vmatmul.mubr.msk.bf16.vlgmr.msra.gmra.mxu1 %vm75_vm1, %v182_v16  ;;  %v870_v16 = vcombine.high %v1698_v57, %v1698_v57 }
  0x19   :  { %1501 = vmatmul.mubr.msk.bf16.gmra.mxu0 %vm75_vm1, %v34_v19  ;;  %v1741_v19 = vrot.slane %v1716_v7, %v1722_v10 }
  0x1a   :  { %1504 = vmatprep.mubr.msk.bf16.mxu0 %vm1552_vm0, %v2164_v0 }
  0x21   :  { %1505 = vmatmul.mubr.msk.bf16.gmra.mxu0 %vm75_vm1, %v35_v22  ;;  %v1323_v22 = vcombine.high %v1315_v5, %v1315_v5 }
  0xd1   :  { %v119_v36 = vpop.f32.mrf.mxu0 }
  0xd2   :  { %v1685_v39 = vadd.f32 %v1674_v32, %v119_v36  ;;  %v1468_v36 = vld [vmem:[%s2160_s6 + $0x6] ss:$0 sm:$0xff] }
  0xd3   :  { %v1518_v44 = vpop.f32.mrf.mxu1  ;;  %v1498_v46 = vpop.f32.mrf.mxu0 }
  0xd4   :  { %v148_v47 = vmul.f32 0.70710677, %v1685_v39  ;;  %v1690_v48 = vadd.f32 %v1518_v44, %v1681_v37  ;;  %v1796_v46 = vrot.slane %v1323_v22, %v1676_v33 }
  0xd5   :  { %v262_v51 = vpop.f32.mrf.mxu1  ;;  %v122_v52 = vpop.f32.mrf.mxu0 }
  0xd6   :  { %1533 = verf.f32 %v148_v47  ;;  %v281_v54 = vmul.f32 0.70710677, %v1690_v48  ;;  %v1695_v55 = vadd.f32 %v1681_v37, %v262_v51  ;;  %v1701_v59 = vadd.f32 %v1674_v32, %v122_v52 }
  0xd7   :  { %v1519_v60 = vpop.f32.mrf.mxu1  ;;  %v1499_v61 = vpop.f32.mrf.mxu0  ;;  %v1800_v47 = vrot.slane %v1760_v28, %v1722_v10  ;;  %v1806_v51 = vrot.slane %v1460_v35, %v1722_v10  ;;  %v1812_v52 = vrot.slane %v1469_v38, %v1722_v10 }
  0xd8   :  { %1535 = verf.f32 %v281_v54  ;;  %v279_v63 = vmul.f32 0.70710677, %v1695_v55  ;;  %v149_v9 = vmul.f32 0.70710677, %v1701_v59  ;;  %v276_v5 = vmul.f32 0.5, %v1695_v55 }
  0xd9   :  { %v127_v6 = vpop.f32.mrf.mxu0  ;;  %v265_v23 = vpop.f32.mrf.mxu1  ;;  %v979_v61 = vcombine.high %v1460_v35, %v1460_v35  ;;  %v1204_v60 = vcombine.high %v1468_v36, %v1468_v36 }
  0xda   :  { %1537 = verf.f32 %v279_v63  ;;  %v1791_v44 = vadd.f32 %v1681_v37, %v265_v23  ;;  %v1803_v49 = vadd.f32 %v1674_v32, %v127_v6  ;;  %v1809_v37 = vrot.slane %v1468_v36, %v1722_v10 }
  0xdb   :  { %v1502_v13 = vpop.f32.mrf.mxu0  ;;  %1539 = verf.f32 %v149_v9  ;;  %v142_v63 = vmul.f32 0.5, %v1685_v39  ;;  %v278_v23 = vmul.f32 0.5, %v1690_v48 }
  0xdc   :  { %v280_v4 = vmul.f32 0.70710677, %v1791_v44  ;;  %v150_v9 = vmul.f32 0.70710677, %v1803_v49  ;;  %v720_v13 = vcombine.high %v1716_v7, %v1716_v7 }
  0xdd   :  { %v1747_v24 = vpop.f32.mrf.mxu0 }
  0xde   :  { %1541 = verf.f32 %v280_v4  ;;  %v1846_v36 = vrot.slane %v720_v13, %v1722_v10  ;;  %v1855_v4 = vrot.slane %v979_v61, %v1722_v10 }
  0xdf   :  { %v1503_v40 = vpop.f32.mrf.mxu0  ;;  %1543 = verf.f32 %v150_v9 }
  0xe0   :  { %2172 = vst [vmem:[#allocation2_spill] sm:$0xff] %v1846_v36  ;;  %2174 = vst [vmem:[#allocation4_spill] sm:$0xff] %v1855_v4  ;;  %v2180_v4 = vcombine.high %v1788_v43, %v1788_v43 }
  0xe1   :  { %v135_v50 = vpop.f32.mrf.mxu0 }
  0xe3   :  { %v1534_v54 = vpop.eup %1533  ;;  %v1506_v62 = vpop.f32.mrf.mxu0 }
  0xe4   :  { %v160_v1 = vadd.f32 1.0, %v1534_v54  ;;  %v737_v54 = vcombine.high %v1732_v15, %v1732_v15 }
  0xe5   :  { %v1536_v6 = vpop.eup %1535  ;;  %v138_v22 = vpop.f32.mrf.mxu0 }
  0xe6   :  { %v166_v39 = vmul.f32 %v160_v1, %v142_v63  ;;  %v287_v40 = vadd.f32 1.0, %v1536_v6  ;;  %v1852_v1 = vrot.slane %v962_v18, %v1722_v10  ;;  %v1858_v6 = vrot.slane %v1204_v60, %v1722_v10 }
  0xe7   :  { %v1538_v62 = vpop.eup %1537  ;;  %v1507_v53 = vpop.f32.mrf.mxu0  ;;  %v131_v18 = vadd.f32 %v1674_v32, %v1747_v24 }
  0xe8   :  { %v172_v58 = vmul.f32 5.656854, %v166_v39  ;;  %v290_v7 = vmul.f32 %v287_v40, %v278_v23  ;;  %v285_v56 = vadd.f32 1.0, %v1538_v62  ;;  %v1540_v38 = vpop.eup %1539  ;;  %v1849_v53 = vrot.slane %v737_v54, %v1722_v10 }
  0xe9   :  { %v136_v23 = vadd.f32 %v1674_v32, %v135_v50  ;;  %v1896_v45 = vmul.f32 0.5, %v131_v18 }
  0xea   :  { %v300_v63 = vcombine.high %v172_v58, %v172_v58  ;;  %v293_v55 = vmul.f32 5.656854, %v290_v7  ;;  %v288_v35 = vmul.f32 %v285_v56, %v276_v5  ;;  %2173 = vst [vmem:[#allocation3_spill] sm:$0xff] %v1849_v53  ;;  %v1862_v56 = vrot.slane %v1221_v12, %v1722_v10 }
  0xeb   :  { %v161_v12 = vadd.f32 1.0, %v1540_v38  ;;  %v151_v5 = vmul.f32 0.70710677, %v131_v18  ;;  %v152_v38 = vmul.f32 0.70710677, %v136_v23  ;;  %v1542_v42 = vpop.eup %1541 }
  0xec   :  { %v635_v9 = vcombine.high %v293_v55, %v293_v55  ;;  %v642_v39 = vrot.slane %v293_v55, %v1676_v33  ;;  %v291_v13 = vmul.f32 5.656854, %v288_v35  ;;  %v1872_v60 = vrot.slane %v300_v63, %v1722_v10 }
  0xed   :  { %v143_v55 = vmul.f32 0.5, %v1701_v59  ;;  %v1882_v63 = vadd.f32 %v1674_v32, %v138_v22  ;;  %v277_v32 = vmul.f32 0.5, %v1791_v44  ;;  %v1893_v22 = vrot.slane %v172_v58, %v1722_v10 }
  0xee   :  { %v649_v40 = vrot.slane %v635_v9, %v1676_v33  ;;  %v650_v54 = vcombine.high %v642_v39, %v642_v39  ;;  %v537_v62 = vcombine.high %v291_v13, %v291_v13  ;;  %v544_v7 = vrot.slane %v291_v13, %v1676_v33 }
  0xef   :  { %v658_v9 = vrot.slane %v642_v39, %v1676_v33  ;;  %v316_v59 = vcombine.high %v1872_v60, %v1872_v60  ;;  %v167_v48 = vmul.f32 %v161_v12, %v143_v55  ;;  %v144_v39 = vmul.f32 0.5, %v1803_v49  ;;  %v1544_v55 = vpop.eup %1543 }
  0xf0   :  { %v651_v35 = vcombine.high %v649_v40, %v649_v40  ;;  %v665_v50 = vrot.slane %v649_v40, %v1676_v33  ;;  %v672_v61 = vrot.slane %v650_v54, %v1676_v33  ;;  %v552_v15 = vcombine.high %v544_v7, %v544_v7 }
  0xf1   :  { %v551_v54 = vrot.slane %v537_v62, %v1676_v33  ;;  %v153_v13 = vmul.f32 0.70710677, %v1882_v63  ;;  %v680_v0 = vcombine.high %v658_v9, %v658_v9  ;;  %1545 = verf.f32 %v151_v5 }
  0xf2   :  { %v679_v24 = vrot.slane %v651_v35, %v1676_v33  ;;  %v681_v40 = vcombine.high %v665_v50, %v665_v50  ;;  %v682_v28 = vcombine.high %v672_v61, %v672_v61  ;;  %v1899_v12 = vmul.f32 0.5, %v136_v23 }
  0xf3   :  { %v426_v62 = vcombine.low %v1893_v22, %v316_v59  ;;  %v574_v44 = vrot.slane %v552_v15, %v1676_v33  ;;  %v173_v21 = vmul.f32 5.656854, %v167_v48  ;;  %1547 = verf.f32 %v152_v38 }
  0xf4   :  { %v683_v35 = vcombine.high %v679_v24, %v679_v24  ;;  %v888_v49 = vadd.f32 %v872_v20, %v679_v24  ;;  %v1129_v58 = vadd.f32 %v1112_v25, %v682_v28  ;;  %v1130_v5 = vadd.f32 %v1114_v30, %v681_v40 }
  0xf5   :  { %v553_v18 = vcombine.high %v551_v54, %v551_v54  ;;  %v315_v23 = vcombine.high %v1893_v22, %v1893_v22  ;;  %v567_v15 = vrot.slane %v551_v54, %v1676_v33  ;;  %v286_v48 = vadd.f32 1.0, %v1542_v42 }
  0xf6   :  { %1549 = verf.f32 %v153_v13  ;;  %v887_v20 = vadd.f32 %v870_v16, %v680_v0  ;;  %v1372_v25 = vadd.f32 %v1356_v41, %v683_v35  ;;  %v584_v28 = vcombine.high %v574_v44, %v574_v44 }
  0xf7   :  { %v162_v24 = vadd.f32 1.0, %v1544_v55  ;;  %v1922_v30 = vrot.slane %v426_v62, %v1727_v14  ;;  %v560_v38 = vrot.slane %v544_v7, %v1676_v33  ;;  %v317_v59 = vcombine.high %v173_v21, %v173_v21 }
  0xf8   :  { %v1926_v40 = vrot.slane %v173_v21, %v1722_v10  ;;  %v900_v42 = vcombine.low %v887_v20, %v888_v49  ;;  %v1142_v13 = vcombine.low %v1129_v58, %v1130_v5  ;;  %v2175_v0 = vcombine.high %v1709_v3, %v1709_v3 }
  0xf9   :  { %v581_v54 = vrot.slane %v553_v18, %v1676_v33  ;;  %v1933_v41 = vadd.f32 %v1725_v11, %v658_v9  ;;  %v1936_v22 = vadd.f32 %v1737_v17, %v672_v61  ;;  %v583_v35 = vcombine.high %v567_v15, %v567_v15 }
  0xfa   :  { %v1371_v16 = vadd.f32 %v2175_v0, %v665_v50  ;;  %v289_v7 = vmul.f32 %v286_v48, %v277_v32  ;;  %v882_v21 = vadd.f32 %v1769_v31, %v584_v28  ;;  %v1123_v62 = vadd.f32 %v1772_v34, %v574_v44 }
  0xfb   :  { %v1124_v49 = vadd.f32 %v1788_v43, %v567_v15  ;;  %v2176_v58 = vmov 0.0   ;;  %v582_v5 = vcombine.high %v560_v38, %v560_v38  ;;  %v168_v11 = vmul.f32 %v162_v24, %v144_v39 }
  0xfc   :  { %v1384_v55 = vcombine.low %v1371_v16, %v1372_v25  ;;  %v1943_v50 = vcombine.high %v1922_v30, %v2176_v58  ;;  %v292_v18 = vmul.f32 5.656854, %v289_v7  ;;  %v1946_v9 = vrot.slane %v900_v42, %v1676_v33 }
  0xfd   :  { %v1949_v17 = vrot.slane %v1142_v13, %v1676_v33  ;;  %v585_v61 = vcombine.high %v581_v54, %v581_v54  ;;  %v881_v32 = vadd.f32 %v1752_v26, %v560_v38  ;;  %v2177_v44 = vcombine.high %v1752_v26, %v1752_v26 }
  0xfe   :  { %v586_v48 = vcombine.high %v292_v18, %v292_v18  ;;  %v593_v20 = vrot.slane %v292_v18, %v1676_v33  ;;  %v174_v25 = vmul.f32 5.656854, %v168_v11  ;;  %v1957_v28 = vrot.slane %v1384_v55, %v1676_v33  ;;  %v1546_v13 = vpop.eup %1545 }
  0xff   :  { %v883_v15 = vadd.f32 %v2177_v44, %v583_v35  ;;  %v897_v39 = vcombine.low %v881_v32, %v882_v21  ;;  %v1139_v24 = vcombine.low %v1123_v62, %v1124_v49  ;;  %v1366_v42 = vadd.f32 %v1796_v46, %v581_v54 }
 0x100   :  { %v1365_v0 = vadd.f32 %v1755_v27, %v582_v5  ;;  %v600_v38 = vrot.slane %v586_v48, %v1676_v33  ;;  %v601_v16 = vcombine.high %v593_v20, %v593_v20  ;;  %v609_v26 = vrot.slane %v593_v20, %v1676_v33  ;;  %v1548_v35 = vpop.eup %1547 }
 0x101   :  { %v331_v7 = vrot.slane %v317_v59, %v1722_v10  ;;  %v462_v55 = vcombine.low %v315_v23, %v1926_v40  ;;  %v1968_v21 = vrot.slane %v174_v25, %v1722_v10  ;;  %v907_v32 = vrot.slane %v897_v39, %v1676_v33 }
 0x102   :  { %v602_v54 = vcombine.high %v600_v38, %v600_v38  ;;  %v616_v62 = vrot.slane %v600_v38, %v1676_v33  ;;  %v623_v49 = vrot.slane %v601_v16, %v1676_v33  ;;  %v631_v5 = vcombine.high %v609_v26, %v609_v26 }
 0x103   :  { %v1972_v11 = vpop.eup %1549  ;;  %v1149_v59 = vrot.slane %v1139_v24, %v1676_v33  ;;  %v1381_v44 = vcombine.low %v1365_v0, %v1366_v42  ;;  %v2178_v48 = vcombine.high %v1772_v34, %v1772_v34  ;;  %v2179_v38 = vcombine.high %v1769_v31, %v1769_v31 }
 0x104   :  { %v630_v20 = vrot.slane %v602_v54, %v1676_v33  ;;  %v632_v18 = vcombine.high %v616_v62, %v616_v62  ;;  %v633_v53 = vcombine.high %v623_v49, %v623_v49  ;;  %v1126_v36 = vadd.f32 %v2180_v4, %v631_v5 }
 0x105   :  { %v1125_v23 = vadd.f32 %v2178_v48, %v585_v61  ;;  %v884_v16 = vadd.f32 %v2179_v38, %v623_v49  ;;  %v2181_v39 = vcombine.high %v1755_v27, %v1755_v27  ;;  %v349_v34 = vcombine.high %v1968_v21, %v1968_v21 }
 0x106   :  { %v163_v61 = vadd.f32 1.0, %v1546_v13  ;;  %v634_v42 = vcombine.high %v630_v20, %v630_v20  ;;  %v1127_v54 = vadd.f32 %v1719_v8, %v630_v20  ;;  %v2182_v31 = vcombine.high %v1796_v46, %v1796_v46 }
 0x107   :  { %v1367_v24 = vadd.f32 %v2181_v39, %v609_v26  ;;  %v898_v0 = vcombine.low %v883_v15, %v884_v16  ;;  %v885_v43 = vadd.f32 %v1698_v57, %v616_v62  ;;  %v1140_v4 = vcombine.low %v1125_v23, %v1126_v36 }
 0x108   :  { %v1368_v49 = vadd.f32 %v2182_v31, %v633_v53  ;;  %v1369_v5 = vadd.f32 %v1709_v3, %v632_v18  ;;  %v334_v27 = vcombine.high %v174_v25, %v174_v25  ;;  %v886_v26 = vadd.f32 %v1706_v2, %v634_v42 }
 0x109   :  { %v914_v48 = vrot.slane %v898_v0, %v1676_v33  ;;  %v1141_v13 = vcombine.low %v1127_v54, %v1933_v41  ;;  %v1391_v8 = vrot.slane %v1381_v44, %v1676_v33  ;;  %v1156_v20 = vrot.slane %v1140_v4, %v1676_v33 }
 0x10a   :  { %v1382_v15 = vcombine.low %v1367_v24, %v1368_v49  ;;  %v1383_v46 = vcombine.low %v1369_v5, %v1936_v22  ;;  %v435_v53 = vcombine.low %v331_v7, %v349_v34  ;;  %v899_v38 = vcombine.low %v885_v43, %v886_v26 }
 0x10b   :  { %v1163_v57 = vrot.slane %v1141_v13, %v1676_v33  ;;  %v164_v36 = vadd.f32 1.0, %v1548_v35  ;;  %v1171_v25 = vcombine.low %v1149_v59, %v1156_v20  ;;  %v348_v18 = vrot.slane %v334_v27, %v1722_v10 }
 0x10c   :  { %v1398_v3 = vrot.slane %v1382_v15, %v1676_v33  ;;  %v1405_v2 = vrot.slane %v1383_v46, %v1676_v33  ;;  %v169_v41 = vmul.f32 %v163_v61, %v1896_v45  ;;  %v921_v62 = vrot.slane %v899_v38, %v1676_v33 }
 0x10d   :  { %v929_v44 = vcombine.low %v907_v32, %v914_v48  ;;  %v1172_v23 = vcombine.low %v1163_v57, %v1949_v17  ;;  %v333_v16 = vcombine.high %v331_v7, %v331_v7  ;;  %v469_v39 = vrot.slane %v462_v55, %v1727_v14 }
 0x10e   :  { %v1413_v22 = vcombine.low %v1391_v8, %v1398_v3  ;;  %v1414_v24 = vcombine.low %v1405_v2, %v1957_v28  ;;  %v442_v35 = vrot.slane %v435_v53, %v1727_v14  ;;  %v930_v59 = vcombine.low %v921_v62, %v1946_v9 }
 0x10f   :  { %v1179_v34 = vrot.slane %v1171_v25, %v1676_v33  ;;  %v1186_v42 = vrot.slane %v1172_v23, %v1676_v33  ;;  %v350_v61 = vcombine.high %v348_v18, %v348_v18  ;;  %v471_v17 = vcombine.low %v333_v16, %v348_v18 }
 0x110   :  { %v1421_v45 = vrot.slane %v1413_v22, %v1676_v33  ;;  %v1428_v32 = vrot.slane %v1414_v24, %v1676_v33  ;;  %v175_v0 = vmul.f32 5.656854, %v169_v41  ;;  %v937_v7 = vrot.slane %v929_v44, %v1676_v33 }
 0x111   :  { %v944_v55 = vrot.slane %v930_v59, %v1676_v33  ;;  %v1187_v28 = vcombine.low %v1179_v34, %v1186_v42  ;;  %v170_v54 = vmul.f32 %v164_v36, %v1899_v12  ;;  %v2183_v9 = vcombine.high %v1926_v40, %v1926_v40 }
 0x112   :  { %v1429_v49 = vcombine.low %v1421_v45, %v1428_v32  ;;  %v1220_v43 = vcombine.high %v1858_v6, %v1858_v6  ;;  %v1237_v4 = vcombine.high %v1862_v56, %v1862_v56  ;;  %v762_v5 = vadd.f32 %v1741_v19, %v1922_v30 }
 0x113   :  { %v498_v31 = vcombine.low %v1872_v60, %v2183_v9  ;;  %v945_v27 = vcombine.low %v937_v7, %v944_v55  ;;  %1465 = vst.msk [vmem:[%s2163_s7 + $0x28] sm:$0xff] %vm814_vm2, %v1187_v28  ;;  %v443_v33 = vcombine.high %v442_v35, %v2176_v58  ;;  %v147_v60 = vmul.f32 0.5, %v1882_v63 }
 0x114   :  { %1474 = vst.msk [vmem:[%s2163_s7 + $0x40] sm:$0xff] %vm814_vm2, %v1429_v49  ;;  %v478_v12 = vrot.slane %v471_v17, %v1727_v14  ;;  %v507_v40 = vcombine.low %v1968_v21, %v350_v61  ;;  %v351_v30 = vcombine.high %v175_v0, %v175_v0  ;;  %v358_v26 = vrot.slane %v175_v0, %v1722_v10 }
 0x115   :  { %v766_v48 = vadd.f32 %v1764_v29, %v1943_v50  ;;  %v470_v13 = vcombine.high %v469_v39, %v2176_v58  ;;  %1456 = vst.msk [vmem:[%s2163_s7 + $0x10] sm:$0xff] %vm814_vm2, %v945_v27  ;;  %v176_v63 = vmul.f32 5.656854, %v170_v54  ;;  %v165_v15 = vadd.f32 1.0, %v1972_v11 }
 0x116   :  { %v505_v8 = vrot.slane %v498_v31, %v1727_v14  ;;  %v1004_v21 = vadd.f32 %v1800_v47, %v469_v39  ;;  %v2184_v20 = vcombine.high %v1741_v19, %v1741_v19  ;;  %v365_v50 = vrot.slane %v351_v30, %v1722_v10 }
 0x117   :  { %v366_v53 = vcombine.high %v358_v26, %v358_v26  ;;  %v368_v38 = vcombine.high %v176_v63, %v176_v63  ;;  %v375_v57 = vrot.slane %v176_v63, %v1722_v10  ;;  %v171_v3 = vmul.f32 %v165_v15, %v147_v60 }
 0x118   :  { %v763_v46 = vadd.f32 %v2184_v20, %v442_v35  ;;  %v479_v36 = vcombine.high %v478_v12, %v2176_v58  ;;  %v514_v25 = vrot.slane %v507_v40, %v1727_v14  ;;  %v2185_v11 = vcombine.high %v1764_v29, %v1764_v29 }
 0x119   :  { %v367_v18 = vcombine.high %v365_v50, %v365_v50  ;;  %v2186_v19 = vcombine.high %v1800_v47, %v1800_v47  ;;  %v383_v62 = vcombine.high %v375_v57, %v375_v57  ;;  %v480_v44 = vcombine.low %v366_v53, %v375_v57 }
 0x11a   :  { %v767_v2 = vadd.f32 %v2185_v11, %v443_v33  ;;  %v177_v23 = vmul.f32 5.656854, %v171_v3  ;;  %v506_v22 = vcombine.high %v505_v8, %v2176_v58  ;;  %v1008_v16 = vadd.f32 %v1806_v51, %v470_v13 }
 0x11b   :  { %v1005_v41 = vadd.f32 %v2186_v19, %v478_v12  ;;  %v444_v39 = vcombine.low %v358_v26, %v367_v18  ;;  %v382_v24 = vrot.slane %v368_v38, %v1722_v10  ;;  %v778_v35 = vcombine.low %v762_v5, %v763_v46  ;;  %v2190_v46 = vld [vmem:[#allocation2_spill] sm:$0xff]  ;;  %v2191_v38 = vld [vmem:[#allocation4_spill] sm:$0xff]  ;;  %v2194_v19 = vld [vmem:[#allocation3_spill] sm:$0xff] }
 0x11c   :  { %v487_v59 = vrot.slane %v480_v44, %v1727_v14  ;;  %v516_v29 = vcombine.low %v365_v50, %v383_v62  ;;  %v385_v34 = vcombine.high %v177_v23, %v177_v23  ;;  %v1246_v42 = vadd.f32 %v1809_v37, %v505_v8 }
 0x11d   :  { %v795_v45 = vcombine.low %v766_v48, %v767_v2  ;;  %v2187_v47 = vcombine.high %v1806_v51, %v1806_v51  ;;  %v392_v61 = vrot.slane %v177_v23, %v1722_v10  ;;  %v515_v17 = vcombine.high %v514_v25, %v2176_v58 }
 0x11e   :  { %v1020_v0 = vcombine.low %v1004_v21, %v1005_v41  ;;  %v451_v7 = vrot.slane %v444_v39, %v1727_v14  ;;  %v399_v55 = vrot.slane %v385_v34, %v1722_v10  ;;  %v1250_v28 = vadd.f32 %v1812_v52, %v506_v22 }
 0x11f   :  { %v1009_v32 = vadd.f32 %v2187_v47, %v479_v36  ;;  %v2188_v54 = vcombine.high %v1809_v37, %v1809_v37  ;;  %v384_v31 = vcombine.high %v382_v24, %v382_v24  ;;  %v400_v49 = vcombine.high %v392_v61, %v392_v61 }
 0x120   :  { %v786_v51 = vrot.slane %v778_v35, %v1722_v10  ;;  %v488_v5 = vcombine.high %v487_v59, %v2176_v58  ;;  %v523_v27 = vrot.slane %v516_v29, %v1727_v14  ;;  %v401_v33 = vcombine.high %v399_v55, %v399_v55 }
 0x121   :  { %v1247_v9 = vadd.f32 %v2188_v54, %v514_v25  ;;  %v803_v60 = vrot.slane %v795_v45, %v1722_v10  ;;  %v1037_v12 = vcombine.low %v1008_v16, %v1009_v32  ;;  %v453_v40 = vcombine.low %v382_v24, %v400_v49 }
 0x122   :  { %v489_v30 = vcombine.low %v384_v31, %v399_v55  ;;  %v1028_v26 = vrot.slane %v1020_v0, %v1722_v10  ;;  %v2189_v37 = vcombine.high %v1812_v52, %v1812_v52  ;;  %v452_v13 = vcombine.high %v451_v7, %v2176_v58 }
 0x123   :  { %v525_v63 = vcombine.low %v392_v61, %v401_v33  ;;  %v1262_v15 = vcombine.low %v1246_v42, %v1247_v9  ;;  %v1006_v8 = vadd.f32 %v1852_v1, %v487_v59  ;;  %v460_v21 = vrot.slane %v453_v40, %v1727_v14 }
 0x124   :  { %v1251_v48 = vadd.f32 %v2189_v37, %v515_v17  ;;  %v496_v20 = vrot.slane %v489_v30, %v1727_v14  ;;  %v764_v50 = vadd.f32 %v2190_v46, %v451_v7  ;;  %v524_v53 = vcombine.high %v523_v27, %v2176_v58 }
 0x125   :  { %v1010_v57 = vadd.f32 %v2191_v38, %v488_v5  ;;  %v532_v3 = vrot.slane %v525_v63, %v1727_v14  ;;  %v461_v52 = vcombine.high %v460_v21, %v2176_v58  ;;  %v2192_v25 = vcombine.high %v2190_v46, %v2190_v46 }
 0x126   :  { %v497_v36 = vcombine.high %v496_v20, %v2176_v58  ;;  %v2193_v2 = vcombine.high %v1852_v1, %v1852_v1  ;;  %v768_v41 = vadd.f32 %v2194_v19, %v452_v13  ;;  %v1248_v62 = vadd.f32 %v1858_v6, %v523_v27 }
 0x127   :  { %v765_v11 = vadd.f32 %v2192_v25, %v460_v21  ;;  %v533_v44 = vcombine.high %v532_v3, %v2176_v58  ;;  %v1249_v14 = vadd.f32 %v1220_v43, %v532_v3  ;;  %v2195_v23 = vcombine.high %v2194_v19, %v2194_v19 }
 0x128   :  { %v1007_v18 = vadd.f32 %v2193_v2, %v496_v20  ;;  %v2196_v39 = vcombine.high %v2191_v38, %v2191_v38  ;;  %v1279_v35 = vcombine.low %v1250_v28, %v1251_v48  ;;  %v1252_v59 = vadd.f32 %v1862_v56, %v524_v53 }
 0x129   :  { %v769_v22 = vadd.f32 %v2195_v23, %v461_v52  ;;  %v779_v16 = vcombine.low %v764_v50, %v765_v11  ;;  %v1253_v58 = vadd.f32 %v1237_v4, %v533_v44  ;;  %v1263_v29 = vcombine.low %v1248_v62, %v1249_v14 }
 0x12a   :  { %v1011_v1 = vadd.f32 %v2196_v39, %v497_v36  ;;  %v1021_v24 = vcombine.low %v1006_v8, %v1007_v18  ;;  %v1045_v45 = vrot.slane %v1037_v12, %v1722_v10  ;;  %v1270_v47 = vrot.slane %v1262_v15, %v1722_v10 }
 0x12b   :  { %v793_v6 = vrot.slane %v779_v16, %v1722_v10  ;;  %v796_v43 = vcombine.low %v768_v41, %v769_v22  ;;  %v1277_v32 = vrot.slane %v1263_v29, %v1722_v10  ;;  %v1280_v61 = vcombine.low %v1252_v59, %v1253_v58 }
 0x12c   :  { %v1035_v34 = vrot.slane %v1021_v24, %v1722_v10  ;;  %v1038_v42 = vcombine.low %v1010_v57, %v1011_v1  ;;  %v1287_v4 = vrot.slane %v1279_v35, %v1722_v10 }
 0x12d   :  { %v794_v17 = vcombine.low %v786_v51, %v793_v6  ;;  %v810_v0 = vrot.slane %v796_v43, %v1722_v10  ;;  %v1278_v55 = vcombine.low %v1270_v47, %v1277_v32  ;;  %v1294_v28 = vrot.slane %v1280_v61, %v1722_v10 }
 0x12e   :  { %v1036_v7 = vcombine.low %v1028_v26, %v1035_v34  ;;  %v1052_v56 = vrot.slane %v1038_v42, %v1722_v10 }
 0x12f   :  { %v811_v54 = vcombine.low %v803_v60, %v810_v0  ;;  %815 = vst.msk [vmem:[%s2163_s7] sm:$0xff] %vm814_vm2, %v794_v17  ;;  %v1295_v31 = vcombine.low %v1287_v4, %v1294_v28  ;;  %1470 = vst.msk [vmem:[%s2163_s7 + $0x30] sm:$0xff] %vm814_vm2, %v1278_v55 }
 0x130   :  { %v1053_v9 = vcombine.low %v1045_v45, %v1052_v56  ;;  %1461 = vst.msk [vmem:[%s2163_s7 + $0x18] sm:$0xff] %vm814_vm2, %v1036_v7 }
 0x131   :  { %816 = vst.msk [vmem:[%s2163_s7 + $0x8] sm:$0xff] %vm814_vm2, %v811_v54  ;;  %1471 = vst.msk [vmem:[%s2163_s7 + $0x38] sm:$0xff] %vm814_vm2, %v1295_v31 }
 0x132   :  { %1462 = vst.msk [vmem:[%s2163_s7 + $0x20] sm:$0xff] %vm814_vm2, %v1053_v9 }

</bundles_post_ra>
